<compile_context>
chip_gen: v7x
topology: tpu7x:2x2x1
jax: 0.10.0
libtpu: 0.0.40
codegen_flags: <defaults>
</compile_context>

<pallas_src>
import functools

import numpy as np
import jax
import jax.numpy as jnp
from jax.experimental import pallas as pl
from jax.experimental.pallas import tpu as pltpu


_MASKED = 1   # torch masked_fill positions -> score = -1e10
_PAD = 2      # padded (fake) neighbours    -> score = -FLT_MAX (never selected)


def _round_up(x, m):
    return (x + m - 1) // m * m


def mha_kernel(q_ref, k_ref, v_ref, mask_ref,
               wq_ref, wk_ref, wv_ref, wfc_ref, bfc_ref, g_ref, b_ref,
               out_ref, *attn_refs,
               n_head, d_k, d_v, num_neighbors, inv_temperature, eps):
    """Fused MHA forward for one block of TM query rows (all heads at once).

    q_ref    : (TM, d_model)          bf16 queries (also the residual)
    k_ref    : (TM*NN, d_model)       bf16 neighbours of each query row
    v_ref    : (TM*NN, d_model)       bf16
    mask_ref : (TM*NN, n_head)        int8 codes (0 keep / 1 masked / 2 pad)
    wq/wk/wv : (d_model, H*d_k|d_v)   bf16, pre-transposed
    wfc_ref  : (H*d_v, d_model)       bf16, pre-transposed
    bfc/g/b  : (1, d_model)           f32 fc bias, LayerNorm gamma / beta
    out_ref  : (TM, d_model)          f32
    attn_refs: optional ((TM*NN, n_head) bf16,) attention map
    """
    NN = num_neighbors                      # padded to a multiple of 8
    TM, _ = q_ref.shape
    HDK = n_head * d_k
    HDV = n_head * d_v

    q_in = q_ref[...]                                    # (TM, D) bf16, residual

    # --- Q/K/V projections: native-bf16 MXU matmuls, f32 accumulation. ---
    Q = jnp.dot(q_in, wq_ref[...], preferred_element_type=jnp.float32)        # (TM, HDK)
    K = jnp.dot(k_ref[...], wk_ref[...], preferred_element_type=jnp.float32)  # (TM*NN, HDK)
    V = jnp.dot(v_ref[...], wv_ref[...], preferred_element_type=jnp.float32)  # (TM*NN, HDV)

    Q = Q * jnp.float32(inv_temperature)     # fold 1/sqrt(d_k) into Q once

    # --- Scores for ALL heads at once (single full-lane-width multiply). ---
    # prod[r*NN+n, j] = Q[r, j] * K[r*NN+n, j]
    K3 = K.reshape(TM, NN, HDK)                          # layout-preserving (NN % 8 == 0)
    prod = (Q[:, None, :] * K3).reshape(TM * NN, HDK)

    # Segmented reduction over each head's d_k lane group, done on the MXU with
    # a constant 0/1 matrix (keeps the VPU free, no lane-splitting reshapes).
    j = jax.lax.broadcasted_iota(jnp.int32, (HDK, n_head), 0)
    h = jax.lax.broadcasted_iota(jnp.int32, (HDK, n_head), 1)
    seg_qk = ((j >= h * d_k) & (j < (h + 1) * d_k)).astype(jnp.float32)       # (HDK, H)
    scores = jnp.dot(prod, seg_qk, preferred_element_type=jnp.float32)        # (TM*NN, H)

    # Mask codes: 1 -> torch masked_fill(-1e10); 2 -> padded neighbour.
    m = mask_ref[...].astype(jnp.int32)
    scores = jnp.where(m == _MASKED, jnp.float32(-1e10), scores)
    scores = jnp.where(m == _PAD, jnp.float32(jnp.finfo(jnp.float32).min), scores)

    # --- Softmax over the neighbour axis, all heads at once, in f32. ---
    s3 = scores.reshape(TM, NN, n_head)
    smax = jnp.max(s3, axis=1, keepdims=True)            # (TM, 1, H)
    e = jnp.exp(s3 - smax)
    attn3 = e / jnp.sum(e, axis=1, keepdims=True)        # (TM, NN, H)
    # TODO(synk): attention dropout / output dropout are identity (eval mode).

    attn2 = attn3.reshape(TM * NN, n_head)               # (TM*NN, H)
    if attn_refs:                                        # optional output, single store
        attn_refs[0][...] = attn2.astype(attn_refs[0].dtype)

    # --- Context for all heads: broadcast attn over each head's d_v lane group,
    #     multiply at full lane width, reduce over the neighbour (sublane) axis. ---
    attn_b = jnp.concatenate(
        [jnp.broadcast_to(attn2[:, hh:hh + 1], (TM * NN, d_v)) for hh in range(n_head)],
        axis=1)                                          # (TM*NN, HDV), exact f32
    ctx = (attn_b * V).reshape(TM, NN, HDV).sum(axis=1)  # (TM, HDV)

    # --- Output projection: ONE deep matmul over all heads (native bf16 MXU). ---
    y = jnp.dot(ctx.astype(jnp.bfloat16), wfc_ref[...],
                preferred_element_type=jnp.float32)      # (TM, D)
    y = y + bfc_ref[...] + q_in.astype(jnp.float32)      # fc bias + residual

    # LayerNorm (biased variance, torch default eps) in f32.
    mu = jnp.mean(y, axis=-1, keepdims=True)
    var = jnp.mean(jnp.square(y - mu), axis=-1, keepdims=True)
    y = (y - mu) * jax.lax.rsqrt(var + jnp.float32(eps))
    out_ref[...] = (y * g_ref[...] + b_ref[...]).astype(out_ref.dtype)


def multi_head_attention(q, k, v, mask, params, *, n_head, d_k, d_v,
                         block_rows=None, return_attn=True,
                         vmem_block_budget=20 * 1024 * 1024):
    """q: (B, N_src, d_model); k, v: (B, N_src*NN, d_model); mask: (B, N_src, NN) bool."""
    B, N_src, d_model = q.shape
    _, N_ngh, _ = k.shape
    assert N_ngh % N_src == 0
    NN = N_ngh // N_src
    NNp = _round_up(NN, 8)      # keep in-kernel reshapes layout-preserving
    R = B * N_src
    H = n_head

    # --- Streamed operands in bf16 (halves the dominant K/V HBM traffic, puts the
    #     MXU on its native path); mask as int8 codes; small params stay f32. ---
    cdt = jnp.bfloat16
    q2 = q.reshape(R, d_model).astype(cdt)
    k3 = k.reshape(R, NN, d_model).astype(cdt)
    v3 = v.reshape(R, NN, d_model).astype(cdt)

    # Replicate the PyTorch `.repeat(n_head, 1, 1)` mask plumbing exactly: the
    # mask used for (row r, head h) is mask row (r*n_head + h) mod R.
    rows = (jnp.arange(R)[:, None] * H + jnp.arange(H)[None, :]) % R          # (R, H)
    m_codes = mask.reshape(R, NN)[rows].astype(jnp.int8)                      # (R, H, NN)

    if NNp != NN:               # fake neighbours, masked with the stronger code
        k3 = jnp.pad(k3, ((0, 0), (0, NNp - NN), (0, 0)))
        v3 = jnp.pad(v3, ((0, 0), (0, NNp - NN), (0, 0)))
        m_codes = jnp.pad(m_codes, ((0, 0), (0, 0), (0, NNp - NN)),
                          constant_values=_PAD)
    mask_k = jnp.transpose(m_codes, (0, 2, 1)).reshape(R * NNp, H)            # (R*NNp, H)

    # Weights pre-transposed to (in, out), streamed as bf16.
    wqT = params["w_qs"].T.astype(cdt)             # (d_model, H*d_k)
    wkT = params["w_ks"].T.astype(cdt)             # (d_model, H*d_k)
    wvT = params["w_vs"].T.astype(cdt)             # (d_model, H*d_v)
    wfcT = params["fc_w"].T.astype(cdt)            # (H*d_v, d_model)
    bfc = params["fc_b"].reshape(1, d_model).astype(jnp.float32)
    ln_g = params["ln_g"].reshape(1, d_model).astype(jnp.float32)
    ln_b = params["ln_b"].reshape(1, d_model).astype(jnp.float32)

    # --- Row-tile size from a VMEM budget (blocks are double-buffered). ---
    per_row = (2 * 2 * NNp * d_model * 2           # K + V blocks, bf16
               + 2 * d_model * 2                   # q block, bf16
               + 2 * NNp * H                       # mask block, int8
               + 2 * d_model * 4)                  # out block, f32
    if return_attn:
        per_row += 2 * NNp * H * 2                 # attn block, bf16
    if block_rows is not None:
        TM = _round_up(block_rows, 8)
    else:
        TM = max(8, min(512, (vmem_block_budget // per_row) // 8 * 8))
        TM = min(TM, _round_up(R, 8))
        # Keep several grid steps so the "parallel" axis can shard across both
        # v7x TensorCores and the pipeline has work to overlap.
        TM = min(TM, max(8, _round_up(max(R // 8, 1), 8)))
    R_pad = _round_up(R, TM)

    k2 = k3.reshape(R * NNp, d_model)
    v2 = v3.reshape(R * NNp, d_model)
    if R_pad != R:
        pr = R_pad - R
        q2 = jnp.pad(q2, ((0, pr), (0, 0)))
        k2 = jnp.pad(k2, ((0, pr * NNp), (0, 0)))
        v2 = jnp.pad(v2, ((0, pr * NNp), (0, 0)))
        mask_k = jnp.pad(mask_k, ((0, pr * NNp), (0, 0)))

    kernel = functools.partial(
        mha_kernel, n_head=H, d_k=d_k, d_v=d_v, num_neighbors=NNp,
        inv_temperature=float(1.0 / np.power(d_k, 0.5)), eps=1e-5)

    out_spec = pl.BlockSpec((TM, d_model), lambda i: (i, 0))
    if return_attn:
        out_shape = (jax.ShapeDtypeStruct((R_pad, d_model), jnp.float32),
                     jax.ShapeDtypeStruct((R_pad * NNp, H), jnp.bfloat16))
        out_specs = (out_spec, pl.BlockSpec((TM * NNp, H), lambda i: (i, 0)))
    else:
        out_shape = jax.ShapeDtypeStruct((R_pad, d_model), jnp.float32)
        out_specs = out_spec

    results = pl.pallas_call(
        kernel,
        out_shape=out_shape,
        grid=(R_pad // TM,),
        in_specs=[
            pl.BlockSpec((TM, d_model), lambda i: (i, 0)),              # q rows
            pl.BlockSpec((TM * NNp, d_model), lambda i: (i, 0)),        # k rows
            pl.BlockSpec((TM * NNp, d_model), lambda i: (i, 0)),        # v rows
            pl.BlockSpec((TM * NNp, H), lambda i: (i, 0)),              # mask codes
            pl.BlockSpec((d_model, H * d_k), lambda i: (0, 0)),         # Wq^T
            pl.BlockSpec((d_model, H * d_k), lambda i: (0, 0)),         # Wk^T
            pl.BlockSpec((d_model, H * d_v), lambda i: (0, 0)),         # Wv^T
            pl.BlockSpec((H * d_v, d_model), lambda i: (0, 0)),         # Wfc^T
            pl.BlockSpec((1, d_model), lambda i: (0, 0)),               # fc bias
            pl.BlockSpec((1, d_model), lambda i: (0, 0)),               # LN gamma
            pl.BlockSpec((1, d_model), lambda i: (0, 0)),               # LN beta
        ],
        out_specs=out_specs,
        compiler_params=pltpu.CompilerParams(
            dimension_semantics=("parallel",),
            vmem_limit_bytes=48 * 1024 * 1024),
    )(q2, k2, v2, mask_k, wqT, wkT, wvT, wfcT, bfc, ln_g, ln_b)

    if return_attn:
        out_pad, attn_pad = results
    else:
        out_pad = results
    out = out_pad[:R].reshape(B, N_src, d_model)
    if not return_attn:
        return out, None
    attn = attn_pad[:R * NNp].reshape(R, NNp, H)[:, :NN, :]               # (R, NN, H)
    attn_map = jnp.transpose(attn, (0, 2, 1)).reshape(B, N_src, H, NN)
    return out, attn_map.astype(jnp.float32)


def make_params(key, n_head, d_model, d_k, d_v):
    """Deterministic parameter init mirroring MultiHeadAttention.__init__."""
    ks = jax.random.split(key, 6)
    std_qk = np.sqrt(2.0 / (d_model + d_k))
    std_v = np.sqrt(2.0 / (d_model + d_v))
    fc_std = np.sqrt(2.0 / (n_head * d_v + d_model))      # xavier_normal
    return dict(
        w_qs=(std_qk * jax.random.normal(ks[0], (n_head * d_k, d_model))).astype(jnp.float32),
        w_ks=(std_qk * jax.random.normal(ks[1], (n_head * d_k, d_model))).astype(jnp.float32),
        w_vs=(std_v * jax.random.normal(ks[2], (n_head * d_v, d_model))).astype(jnp.float32),
        fc_w=(fc_std * jax.random.normal(ks[3], (d_model, n_head * d_v))).astype(jnp.float32),
        fc_b=(0.1 * jax.random.normal(ks[4], (d_model,))).astype(jnp.float32),
        ln_g=(1.0 + 0.1 * jax.random.normal(ks[5], (d_model,))).astype(jnp.float32),
        ln_b=jnp.zeros((d_model,), jnp.float32),
    )


def mha_reference(q, k, v, mask, params, *, n_head, d_k, d_v):
    """Pure-JAX reference replicating the PyTorch forward (eval mode) exactly."""
    B, N_src, d_model = q.shape
    N_ngh = k.shape[1]
    NN = N_ngh // N_src
    Qp = q.reshape(-1, d_model) @ params["w_qs"].T
    Kp = k.reshape(-1, d_model) @ params["w_ks"].T
    Vp = v.reshape(-1, d_model) @ params["w_vs"].T
    Q = Qp.reshape(B, N_src, 1, n_head, d_k).transpose(0, 1, 3, 2, 4).reshape(-1, 1, d_k)
    K = Kp.reshape(B, N_src, NN, n_head, d_k).transpose(0, 1, 3, 2, 4).reshape(-1, NN, d_k)
    V = Vp.reshape(B, N_src, NN, n_head, d_v).transpose(0, 1, 3, 2, 4).reshape(-1, NN, d_v)
    m = jnp.tile(mask.reshape(B * N_src, 1, NN), (n_head, 1, 1))       # torch .repeat
    attn = jnp.einsum("bqd,bkd->bqk", Q, K) / np.power(d_k, 0.5)
    attn = jnp.where(m, jnp.float32(-1e10), attn)
    attn = jax.nn.softmax(attn, axis=2)
    out = jnp.einsum("bqk,bkd->bqd", attn, V).reshape(B, N_src, n_head * d_v)
    out = out @ params["fc_w"].T + params["fc_b"]
    out = out + q
    mu = out.mean(-1, keepdims=True)
    var = ((out - mu) ** 2).mean(-1, keepdims=True)
    out = (out - mu) / jnp.sqrt(var + 1e-5) * params["ln_g"] + params["ln_b"]
    attn_map = attn.reshape(B, N_src, n_head, NN)
    return out, attn_map


if __name__ == "__main__":
    n_head, d_model, d_k, d_v = 2, 32, 16, 16
    B, N_src, num_neighbors = 2, 4, 8
    N_ngh = N_src * num_neighbors

    key = jax.random.PRNGKey(0)
    kq, kk, kv, km, kp = jax.random.split(key, 5)
    q = jax.random.normal(kq, (B, N_src, d_model), jnp.float32)
    k = jax.random.normal(kk, (B, N_ngh, d_model), jnp.float32)
    v = jax.random.normal(kv, (B, N_ngh, d_model), jnp.float32)
    mask = jax.random.bernoulli(km, 0.3, (B, N_src, num_neighbors))

    params = make_params(kp, n_head, d_model, d_k, d_v)

    # The kernel streams q/k/v and the matmul weights as bf16; pre-round them so
    # the f32 reference sees the same values and the comparison stays tight.
    rnd = lambda x: x.astype(jnp.bfloat16).astype(jnp.float32)
    q, k, v = rnd(q), rnd(k), rnd(v)
    for name in ("w_qs", "w_ks", "w_vs", "fc_w"):
        params[name] = rnd(params[name])

    out, attn_map = multi_head_attention(q, k, v, mask, params,
                                         n_head=n_head, d_k=d_k, d_v=d_v)
    out, attn_map = jax.block_until_ready((out, attn_map))

    ref_out, ref_attn = mha_reference(q, k, v, mask, params,
                                      n_head=n_head, d_k=d_k, d_v=d_v)
    np.testing.assert_allclose(np.asarray(out), np.asarray(ref_out),
                               rtol=2e-2, atol=2e-2)
    np.testing.assert_allclose(np.asarray(attn_map), np.asarray(ref_attn),
                               rtol=2e-2, atol=2e-2)
    assert out.shape == (B, N_src, d_model) and out.dtype == jnp.float32
    assert attn_map.shape == (B, N_src, n_head, num_neighbors)

    print("KERNEL_OK")
</pallas_src>

<mosaic_0001>
module attributes {stable_mosaic.version = 11 : i64} {
  func.func @mha_kernel(%arg0: i32, %arg1: memref<8x32xbf16, #tpu.memory_space<vmem>>, %arg2: memref<64x32xbf16, #tpu.memory_space<vmem>>, %arg3: memref<64x32xbf16, #tpu.memory_space<vmem>>, %arg4: memref<64x2xi8, #tpu.memory_space<vmem>>, %arg5: memref<32x32xbf16, #tpu.memory_space<vmem>>, %arg6: memref<32x32xbf16, #tpu.memory_space<vmem>>, %arg7: memref<32x32xbf16, #tpu.memory_space<vmem>>, %arg8: memref<32x32xbf16, #tpu.memory_space<vmem>>, %arg9: memref<1x32xf32, #tpu.memory_space<vmem>>, %arg10: memref<1x32xf32, #tpu.memory_space<vmem>>, %arg11: memref<1x32xf32, #tpu.memory_space<vmem>>, %arg12: memref<8x32xf32, #tpu.memory_space<vmem>>, %arg13: memref<64x2xbf16, #tpu.memory_space<vmem>>) attributes {dimension_semantics = [#tpu.dimension_semantics<parallel>], iteration_bounds = array<i64: 1>, scalar_prefetch = 0 : i64, scratch_operands = 0 : i64, tpu.core_type = #tpu.core_type<tc>, window_params = [{transform_indices = @transform_0, window_bounds = array<i64: 8, 32>}, {transform_indices = @transform_1, window_bounds = array<i64: 64, 32>}, {transform_indices = @transform_2, window_bounds = array<i64: 64, 32>}, {transform_indices = @transform_3, window_bounds = array<i64: 64, 2>}, {pipeline_mode = #tpu.pipeline_mode<synchronous>, transform_indices = @transform_4, window_bounds = array<i64: 32, 32>}, {pipeline_mode = #tpu.pipeline_mode<synchronous>, transform_indices = @transform_5, window_bounds = array<i64: 32, 32>}, {pipeline_mode = #tpu.pipeline_mode<synchronous>, transform_indices = @transform_6, window_bounds = array<i64: 32, 32>}, {pipeline_mode = #tpu.pipeline_mode<synchronous>, transform_indices = @transform_7, window_bounds = array<i64: 32, 32>}, {pipeline_mode = #tpu.pipeline_mode<synchronous>, transform_indices = @transform_8, window_bounds = array<i64: 1, 32>}, {pipeline_mode = #tpu.pipeline_mode<synchronous>, transform_indices = @transform_9, window_bounds = array<i64: 1, 32>}, {pipeline_mode = #tpu.pipeline_mode<synchronous>, transform_indices = @transform_10, window_bounds = array<i64: 1, 32>}, {transform_indices = @transform_11, window_bounds = array<i64: 8, 32>}, {transform_indices = @transform_12, window_bounds = array<i64: 64, 2>}]} {
    %c0 = arith.constant 0 : index
    %c0_0 = arith.constant 0 : index
    %0 = vector.load %arg1[%c0, %c0_0] : memref<8x32xbf16, #tpu.memory_space<vmem>>, vector<8x32xbf16>
    %c0_1 = arith.constant 0 : index
    %c0_2 = arith.constant 0 : index
    %1 = vector.load %arg5[%c0_1, %c0_2] : memref<32x32xbf16, #tpu.memory_space<vmem>>, vector<32x32xbf16>
    %cst = arith.constant dense<0.000000e+00> : vector<8x32xf32>
    %2 = tpu.matmul %0, %1, %cst {dimension_numbers = #tpu.dot_dimension_numbers<[1], [0], [0], [1], [0, 0, 1, 1], [], []>} : vector<8x32xbf16>, vector<32x32xbf16>, vector<8x32xf32> -> vector<8x32xf32>
    %c0_3 = arith.constant 0 : index
    %c0_4 = arith.constant 0 : index
    %3 = vector.load %arg2[%c0_3, %c0_4] : memref<64x32xbf16, #tpu.memory_space<vmem>>, vector<64x32xbf16>
    %c0_5 = arith.constant 0 : index
    %c0_6 = arith.constant 0 : index
    %4 = vector.load %arg6[%c0_5, %c0_6] : memref<32x32xbf16, #tpu.memory_space<vmem>>, vector<32x32xbf16>
    %cst_7 = arith.constant dense<0.000000e+00> : vector<64x32xf32>
    %5 = tpu.matmul %3, %4, %cst_7 {dimension_numbers = #tpu.dot_dimension_numbers<[1], [0], [0], [1], [0, 0, 1, 1], [], []>} : vector<64x32xbf16>, vector<32x32xbf16>, vector<64x32xf32> -> vector<64x32xf32>
    %c0_8 = arith.constant 0 : index
    %c0_9 = arith.constant 0 : index
    %6 = vector.load %arg3[%c0_8, %c0_9] : memref<64x32xbf16, #tpu.memory_space<vmem>>, vector<64x32xbf16>
    %c0_10 = arith.constant 0 : index
    %c0_11 = arith.constant 0 : index
    %7 = vector.load %arg7[%c0_10, %c0_11] : memref<32x32xbf16, #tpu.memory_space<vmem>>, vector<32x32xbf16>
    %cst_12 = arith.constant dense<0.000000e+00> : vector<64x32xf32>
    %8 = tpu.matmul %6, %7, %cst_12 {dimension_numbers = #tpu.dot_dimension_numbers<[1], [0], [0], [1], [0, 0, 1, 1], [], []>} : vector<64x32xbf16>, vector<32x32xbf16>, vector<64x32xf32> -> vector<64x32xf32>
    %cst_13 = arith.constant 2.500000e-01 : f32
    %9 = vector.broadcast %cst_13 : f32 to vector<8x32xf32>
    %10 = arith.mulf %2, %9 : vector<8x32xf32>
    %11 = vector.shape_cast %5 : vector<64x32xf32> to vector<8x8x32xf32>
    %12 = vector.shape_cast %10 : vector<8x32xf32> to vector<8x1x32xf32>
    %13 = vector.broadcast %12 : vector<8x1x32xf32> to vector<8x8x32xf32>
    %14 = arith.mulf %13, %11 : vector<8x8x32xf32>
    %15 = vector.shape_cast %14 : vector<8x8x32xf32> to vector<64x32xf32>
    %16 = tpu.iota {dimensions = array<i32: 0>} : vector<32x2xi32>
    %17 = tpu.iota {dimensions = array<i32: 1>} : vector<32x2xi32>
    %c16_i32 = arith.constant 16 : i32
    %18 = vector.broadcast %c16_i32 : i32 to vector<32x2xi32>
    %19 = arith.muli %17, %18 : vector<32x2xi32>
    %20 = arith.cmpi sge, %16, %19 : vector<32x2xi32>
    %c1_i32 = arith.constant 1 : i32
    %21 = vector.broadcast %c1_i32 : i32 to vector<32x2xi32>
    %22 = arith.addi %17, %21 : vector<32x2xi32>
    %c16_i32_14 = arith.constant 16 : i32
    %23 = vector.broadcast %c16_i32_14 : i32 to vector<32x2xi32>
    %24 = arith.muli %22, %23 : vector<32x2xi32>
    %25 = arith.cmpi slt, %16, %24 : vector<32x2xi32>
    %26 = arith.andi %20, %25 : vector<32x2xi1>
    %27 = arith.extui %26 : vector<32x2xi1> to vector<32x2xi32>
    %28 = arith.sitofp %27 : vector<32x2xi32> to vector<32x2xf32>
    %cst_15 = arith.constant dense<0.000000e+00> : vector<64x2xf32>
    %29 = tpu.matmul %15, %28, %cst_15 {dimension_numbers = #tpu.dot_dimension_numbers<[1], [0], [0], [1], [0, 0, 1, 1], [], []>} : vector<64x32xf32>, vector<32x2xf32>, vector<64x2xf32> -> vector<64x2xf32>
    %c0_16 = arith.constant 0 : index
    %c0_17 = arith.constant 0 : index
    %30 = vector.load %arg4[%c0_16, %c0_17] : memref<64x2xi8, #tpu.memory_space<vmem>>, vector<64x2xi8>
    %31 = arith.extsi %30 : vector<64x2xi8> to vector<64x2xi32>
    %c1_i32_18 = arith.constant 1 : i32
    %32 = vector.broadcast %c1_i32_18 : i32 to vector<64x2xi32>
    %33 = arith.cmpi eq, %31, %32 : vector<64x2xi32>
    %cst_19 = arith.constant -1.000000e+10 : f32
    %34 = vector.broadcast %cst_19 : f32 to vector<64x2xf32>
    %35 = arith.select %33, %34, %29 : vector<64x2xi1>, vector<64x2xf32>
    %c2_i32 = arith.constant 2 : i32
    %36 = vector.broadcast %c2_i32 : i32 to vector<64x2xi32>
    %37 = arith.cmpi eq, %31, %36 : vector<64x2xi32>
    %cst_20 = arith.constant -3.40282347E+38 : f32
    %38 = vector.broadcast %cst_20 : f32 to vector<64x2xf32>
    %39 = arith.select %37, %38, %35 : vector<64x2xi1>, vector<64x2xf32>
    %40 = vector.shape_cast %39 : vector<64x2xf32> to vector<8x8x2xf32>
    %cst_21 = arith.constant dense<0xFF800000> : vector<8x2xf32>
    %41 = vector.multi_reduction <maximumf>, %40, %cst_21 [1] : vector<8x8x2xf32> to vector<8x2xf32>
    %42 = vector.shape_cast %41 : vector<8x2xf32> to vector<8x1x2xf32>
    %43 = vector.broadcast %42 : vector<8x1x2xf32> to vector<8x8x2xf32>
    %44 = arith.subf %40, %43 : vector<8x8x2xf32>
    %45 = math.exp %44 : vector<8x8x2xf32>
    %cst_22 = arith.constant dense<0.000000e+00> : vector<8x2xf32>
    %46 = vector.multi_reduction <add>, %45, %cst_22 [1] : vector<8x8x2xf32> to vector<8x2xf32>
    %47 = vector.shape_cast %46 : vector<8x2xf32> to vector<8x1x2xf32>
    %48 = vector.broadcast %47 : vector<8x1x2xf32> to vector<8x8x2xf32>
    %49 = arith.divf %45, %48 : vector<8x8x2xf32>
    %50 = vector.shape_cast %49 : vector<8x8x2xf32> to vector<64x2xf32>
    %51 = arith.truncf %50 : vector<64x2xf32> to vector<64x2xbf16>
    %c0_23 = arith.constant 0 : index
    %c0_24 = arith.constant 0 : index
    %52 = vector.load %arg13[%c0_23, %c0_24] : memref<64x2xbf16, #tpu.memory_space<vmem>>, vector<64x2xbf16>
    tpu.vector_store %arg13[%c0_23, %c0_24], %51 {strides = array<i32>} : memref<64x2xbf16, #tpu.memory_space<vmem>>, vector<64x2xbf16>,
    %53 = vector.extract_strided_slice %50 {offsets = [0, 0], sizes = [64, 1], strides = [1, 1]} : vector<64x2xf32> to vector<64x1xf32>
    %54 = vector.shape_cast %53 : vector<64x1xf32> to vector<64x1xf32>
    %55 = vector.broadcast %54 : vector<64x1xf32> to vector<64x16xf32>
    %56 = vector.extract_strided_slice %50 {offsets = [0, 1], sizes = [64, 1], strides = [1, 1]} : vector<64x2xf32> to vector<64x1xf32>
    %57 = vector.shape_cast %56 : vector<64x1xf32> to vector<64x1xf32>
    %58 = vector.broadcast %57 : vector<64x1xf32> to vector<64x16xf32>
    %59 = tpu.concatenate %55, %58 in 1 : vector<64x16xf32>, vector<64x16xf32> -> vector<64x32xf32>
    %60 = arith.mulf %59, %8 : vector<64x32xf32>
    %61 = vector.shape_cast %60 : vector<64x32xf32> to vector<8x8x32xf32>
    %cst_25 = arith.constant dense<0.000000e+00> : vector<8x32xf32>
    %62 = vector.multi_reduction <add>, %61, %cst_25 [1] : vector<8x8x32xf32> to vector<8x32xf32>
    %63 = arith.truncf %62 : vector<8x32xf32> to vector<8x32xbf16>
    %c0_26 = arith.constant 0 : index
    %c0_27 = arith.constant 0 : index
    %64 = vector.load %arg8[%c0_26, %c0_27] : memref<32x32xbf16, #tpu.memory_space<vmem>>, vector<32x32xbf16>
    %cst_28 = arith.constant dense<0.000000e+00> : vector<8x32xf32>
    %65 = tpu.matmul %63, %64, %cst_28 {dimension_numbers = #tpu.dot_dimension_numbers<[1], [0], [0], [1], [0, 0, 1, 1], [], []>} : vector<8x32xbf16>, vector<32x32xbf16>, vector<8x32xf32> -> vector<8x32xf32>
    %c0_29 = arith.constant 0 : index
    %c0_30 = arith.constant 0 : index
    %66 = vector.load %arg9[%c0_29, %c0_30] : memref<1x32xf32, #tpu.memory_space<vmem>>, vector<1x32xf32>
    %67 = vector.broadcast %66 : vector<1x32xf32> to vector<8x32xf32>
    %68 = arith.addf %65, %67 : vector<8x32xf32>
    %69 = arith.extf %0 : vector<8x32xbf16> to vector<8x32xf32>
    %70 = arith.addf %68, %69 : vector<8x32xf32>
    %cst_31 = arith.constant dense<0.000000e+00> : vector<8xf32>
    %71 = vector.multi_reduction <add>, %70, %cst_31 [1] : vector<8x32xf32> to vector<8xf32>
    %72 = vector.shape_cast %71 : vector<8xf32> to vector<8x1xf32>
    %cst_32 = arith.constant 3.200000e+01 : f32
    %73 = vector.broadcast %cst_32 : f32 to vector<8x1xf32>
    %74 = arith.divf %72, %73 : vector<8x1xf32>
    %75 = vector.broadcast %74 : vector<8x1xf32> to vector<8x32xf32>
    %76 = arith.subf %70, %75 : vector<8x32xf32>
    %77 = arith.mulf %76, %76 : vector<8x32xf32>
    %cst_33 = arith.constant dense<0.000000e+00> : vector<8xf32>
    %78 = vector.multi_reduction <add>, %77, %cst_33 [1] : vector<8x32xf32> to vector<8xf32>
    %79 = vector.shape_cast %78 : vector<8xf32> to vector<8x1xf32>
    %cst_34 = arith.constant 3.200000e+01 : f32
    %80 = vector.broadcast %cst_34 : f32 to vector<8x1xf32>
    %81 = arith.divf %79, %80 : vector<8x1xf32>
    %82 = vector.broadcast %74 : vector<8x1xf32> to vector<8x32xf32>
    %83 = arith.subf %70, %82 : vector<8x32xf32>
    %cst_35 = arith.constant 9.99999974E-6 : f32
    %84 = vector.broadcast %cst_35 : f32 to vector<8x1xf32>
    %85 = arith.addf %81, %84 : vector<8x1xf32>
    %86 = math.rsqrt %85 : vector<8x1xf32>
    %87 = vector.broadcast %86 : vector<8x1xf32> to vector<8x32xf32>
    %88 = arith.mulf %83, %87 : vector<8x32xf32>
    %c0_36 = arith.constant 0 : index
    %c0_37 = arith.constant 0 : index
    %89 = vector.load %arg10[%c0_36, %c0_37] : memref<1x32xf32, #tpu.memory_space<vmem>>, vector<1x32xf32>
    %90 = vector.broadcast %89 : vector<1x32xf32> to vector<8x32xf32>
    %91 = arith.mulf %88, %90 : vector<8x32xf32>
    %c0_38 = arith.constant 0 : index
    %c0_39 = arith.constant 0 : index
    %92 = vector.load %arg11[%c0_38, %c0_39] : memref<1x32xf32, #tpu.memory_space<vmem>>, vector<1x32xf32>
    %93 = vector.broadcast %92 : vector<1x32xf32> to vector<8x32xf32>
    %94 = arith.addf %91, %93 : vector<8x32xf32>
    %c0_40 = arith.constant 0 : index
    %c0_41 = arith.constant 0 : index
    %95 = vector.load %arg12[%c0_40, %c0_41] : memref<8x32xf32, #tpu.memory_space<vmem>>, vector<8x32xf32>
    tpu.vector_store %arg12[%c0_40, %c0_41], %94 {strides = array<i32>} : memref<8x32xf32, #tpu.memory_space<vmem>>, vector<8x32xf32>,
    return
  }
  func.func @transform_0(%arg0: i32) -> (i32, i32) {
    %c0_i32 = arith.constant 0 : i32
    %c0_i32_0 = arith.constant 0 : i32
    return %arg0, %c0_i32 : i32, i32
  }
  func.func @transform_1(%arg0: i32) -> (i32, i32) {
    %c0_i32 = arith.constant 0 : i32
    %c0_i32_0 = arith.constant 0 : i32
    return %arg0, %c0_i32 : i32, i32
  }
  func.func @transform_2(%arg0: i32) -> (i32, i32) {
    %c0_i32 = arith.constant 0 : i32
    %c0_i32_0 = arith.constant 0 : i32
    return %arg0, %c0_i32 : i32, i32
  }
  func.func @transform_3(%arg0: i32) -> (i32, i32) {
    %c0_i32 = arith.constant 0 : i32
    %c0_i32_0 = arith.constant 0 : i32
    return %arg0, %c0_i32 : i32, i32
  }
  func.func @transform_4(%arg0: i32) -> (i32, i32) {
    %c0_i32 = arith.constant 0 : i32
    %c0_i32_0 = arith.constant 0 : i32
    %c0_i32_1 = arith.constant 0 : i32
    return %c0_i32, %c0_i32_0 : i32, i32
  }
  func.func @transform_5(%arg0: i32) -> (i32, i32) {
    %c0_i32 = arith.constant 0 : i32
    %c0_i32_0 = arith.constant 0 : i32
    %c0_i32_1 = arith.constant 0 : i32
    return %c0_i32, %c0_i32_0 : i32, i32
  }
  func.func @transform_6(%arg0: i32) -> (i32, i32) {
    %c0_i32 = arith.constant 0 : i32
    %c0_i32_0 = arith.constant 0 : i32
    %c0_i32_1 = arith.constant 0 : i32
    return %c0_i32, %c0_i32_0 : i32, i32
  }
  func.func @transform_7(%arg0: i32) -> (i32, i32) {
    %c0_i32 = arith.constant 0 : i32
    %c0_i32_0 = arith.constant 0 : i32
    %c0_i32_1 = arith.constant 0 : i32
    return %c0_i32, %c0_i32_0 : i32, i32
  }
  func.func @transform_8(%arg0: i32) -> (i32, i32) {
    %c0_i32 = arith.constant 0 : i32
    %c0_i32_0 = arith.constant 0 : i32
    %c0_i32_1 = arith.constant 0 : i32
    return %c0_i32, %c0_i32_0 : i32, i32
  }
  func.func @transform_9(%arg0: i32) -> (i32, i32) {
    %c0_i32 = arith.constant 0 : i32
    %c0_i32_0 = arith.constant 0 : i32
    %c0_i32_1 = arith.constant 0 : i32
    return %c0_i32, %c0_i32_0 : i32, i32
  }
  func.func @transform_10(%arg0: i32) -> (i32, i32) {
    %c0_i32 = arith.constant 0 : i32
    %c0_i32_0 = arith.constant 0 : i32
    %c0_i32_1 = arith.constant 0 : i32
    return %c0_i32, %c0_i32_0 : i32, i32
  }
  func.func @transform_11(%arg0: i32) -> (i32, i32) {
    %c0_i32 = arith.constant 0 : i32
    %c0_i32_0 = arith.constant 0 : i32
    return %arg0, %c0_i32 : i32, i32
  }
  func.func @transform_12(%arg0: i32) -> (i32, i32) {
    %c0_i32 = arith.constant 0 : i32
    %c0_i32_0 = arith.constant 0 : i32
    return %arg0, %c0_i32 : i32, i32
  }
}

</mosaic_0001>

<bundles_post_ra>
// kernel: tpu_custom_call.1
= control target key start
LH: loop header
LB: loop body
LE: loop exit
PB: predicated region body
PF: predicated region fallthrough
CT: control target
= control target key end

     0   :  { %v1409_v1 = vmov 0.0   ;;  %v351_v3 = vlaneseq  ;;  %vm1410_vm0 = vmmov 0   ;;  %vm59_vm1 = vcmask 261120   ;;  %s1810_s0 = inlined_call_operand.vmem [shape: bf16[8,32], index: 0, kind: input, shape index: {}]   ;;  %s1811_s1 = inlined_call_operand.vmem [shape: bf16[64,32], index: 1, kind: input, shape index: {}]   ;;  %s1812_s2 = inlined_call_operand.vmem [shape: bf16[64,32], index: 2, kind: input, shape index: {}]   ;;  %s1813_s3 = inlined_call_operand.vmem [shape: s8[64,2], index: 3, kind: input, shape index: {}]   ;;  %s1814_s4 = inlined_call_operand.vmem [shape: bf16[32,32], index: 4, kind: input, shape index: {}]   ;;  %s1815_s5 = inlined_call_operand.vmem [shape: bf16[32,32], index: 5, kind: input, shape index: {}]   ;;  %s1816_s6 = inlined_call_operand.vmem [shape: bf16[32,32], index: 6, kind: input, shape index: {}]   ;;  %s1817_s7 = inlined_call_operand.vmem [shape: bf16[32,32], index: 7, kind: input, shape index: {}]   ;;  %s1818_s8 = inlined_call_operand.vmem [shape: f32[1,32], index: 8, kind: input, shape index: {}]   ;;  %s1819_s9 = inlined_call_operand.vmem [shape: f32[1,32], index: 9, kind: input, shape index: {}]   ;;  %s1820_s10 = inlined_call_operand.vmem [shape: f32[1,32], index: 10, kind: input, shape index: {}]   ;;  %s1821_s11 = inlined_call_operand.hbm [shape: f32[8,32], index: 11, kind: output, shape index: {0}]   ;;  %s1822_s12 = inlined_call_operand.vmem [shape: bf16[64,2], index: 12, kind: output, shape index: {1}]  }
   0x1   :  { %v1334_v0 = vld [vmem:[%s1814_s4] sm:$0xff]   ;;  %1253 = vmatprep.subr.bf16.mxu0 %v1409_v1  ;;  %v1336_v4 = vld [vmem:[%s1814_s4 + $0x8] sm:$0xff]   ;;  %1257 = vmatprep.mubr.msk.bf16.mxu0 %vm1410_vm0, %v1409_v1  ;;  %v1340_v12 = vld [vmem:[%s1811_s1 + $0x10] sm:$0xff]   ;;  %v1411_v17 = vmov 1.0|1.0  }
   0x2   :  { %v1335_v2 = vld [vmem:[%s1815_s5] sm:$0xff]   ;;  %1254 = vmatpush3.bf16.msra.mxu0 %v1334_v0  ;;  %v1337_v5 = vld [vmem:[%s1815_s5 + $0x8] sm:$0xff]   ;;  %v1497_v6 = vshrl.u32 %v351_v3, 7  ;;  %v450_v9 = vand.u32 127, %v351_v3  ;;  %v1341_v16 = vld [vmem:[%s1811_s1 + $0x18] sm:$0xff]  }
   0x3   :  { %1261 = vmatprep.subr.bf16.mxu1 %v1335_v2  ;;  %1255 = vmatprep.subr.bf16.mxu0 %v1409_v1  ;;  %v42_v7 = vld [vmem:[%s1810_s0] sm:$0xf]  ;;  %v1339_v10 = vld [vmem:[%s1811_s1 + $0x8] sm:$0xff]  }
   0x4   :  { %1262 = vmatpush3.bf16.msra.mxu1 %v1335_v2  ;;  %v1338_v8 = vld [vmem:[%s1811_s1] sm:$0xff]   ;;  %v446_v11 = vadd.s32 8, %v1497_v6  ;;  %v451_v13 = vmul.u32 16, %v450_v9  ;;  %v456_v14 = vadd.s32 1, %v450_v9 }
   0x5   :  { %1263 = vmatprep.subr.bf16.mxu1 %v1337_v5  ;;  %1265 = vmatprep.mubr.msk.bf16.mxu1 %vm59_vm1, %v1338_v8 }
   0x6   :  { %1256 = vmatpush3.bf16.msra.mxu0 %v1336_v4  ;;  %vm452_vm2 = vcmp.ge.s32.totalorder %v1497_v6, %v451_v13  ;;  %v457_v15 = vmul.u32 16, %v456_v14  ;;  %vm453_vm3 = vcmp.ge.s32.totalorder %v446_v11, %v451_v13 }
   0x8   :  { %1264 = vmatpush3.bf16.msra.mxu1 %v1337_v5  ;;  %vm458_vm4 = vcmp.lt.s32.totalorder %v1497_v6, %v457_v15  ;;  %vm459_vm5 = vcmp.lt.s32.totalorder %v446_v11, %v457_v15 }
   0x9   :  { %1258 = vmatmul.mubr.msk.bf16.vlgmr.msra.gmra.mrb[0].mxu0 %vm59_vm1, %v42_v7  ;;  %vm462_vm6 = vmand %vm452_vm2, %vm458_vm4 }
   0xa   :  { %vm463_vm7 = vmand %vm453_vm3, %vm459_vm5 }
   0xb   :  { %1266 = vmatmul.mubr.msk.bf16.vlgmr.msra.gmra.mrb[0].mxu1 %vm59_vm1, %v1339_v10  ;;  %vm1313_vm8 = vmpackc.low %vm463_vm7, %vm462_vm6 }
   0xc   :  { %1269 = vmatprep.mubr.msk.bf16.mxu1 %vm59_vm1, %v1340_v12  ;;  %1314 = vmatprep.subr.msk.bf16.mxu1 %vm1313_vm8, %v1411_v17 }
   0xd   :  { %18 = vsyncpa [#allocation3], 0  ;;  %1316 = vmatpush3.bf16.msk.msra.mxu1 %vm1313_vm8, %v1411_v17  ;;  %v447_v18 = vadd.s32 16, %v1497_v6  ;;  %v448_v19 = vadd.s32 24, %v1497_v6  ;;  %v1342_v20 = vld [vmem:[%s1816_s6] sm:$0xff]   ;;  %v1343_v21 = vld [vmem:[%s1816_s6 + $0x8] sm:$0xff]  }
   0xe   :  { %v1344_v22 = vld [vmem:[%s1812_s2] sm:$0xff]   ;;  %1273 = vmatprep.subr.bf16.mxu0 %v1342_v20  ;;  %v1345_v23 = vld [vmem:[%s1812_s2 + $0x8] sm:$0xff]   ;;  %v1346_v24 = vld [vmem:[%s1812_s2 + $0x10] sm:$0xff]   ;;  %v1412_v26 = vmov 1966171168   ;;  %v398_v38 = vsub.s32 0, %v1497_v6 }
   0xf   :  { %vm454_vm9 = vcmp.ge.s32.totalorder %v447_v18, %v451_v13  ;;  %vm455_vm10 = vcmp.ge.s32.totalorder %v448_v19, %v451_v13  ;;  %vm460_vm11 = vcmp.lt.s32.totalorder %v447_v18, %v457_v15  ;;  %vm461_vm12 = vcmp.lt.s32.totalorder %v448_v19, %v457_v15  ;;  %1277 = vmatprep.mubr.msk.bf16.mxu0 %vm59_vm1, %v1344_v22  ;;  %v1347_v25 = vld [vmem:[%s1812_s2 + $0x18] sm:$0xff]   ;;  %v1208_v14 = vld [vmem:[%s1813_s3] sm:$0xff]  }
  0x10   :  { %vm464_vm13 = vmand %vm454_vm9, %vm460_vm11  ;;  %1274 = vmatpush3.bf16.msra.mxu0 %v1342_v20  ;;  %v349_v27 = vunpack.c.l.s4 %v1412_v26  ;;  %v1413_v10 = vmov 1   ;;  %v1414_v11 = vmov 0   ;;  %v1210_v15 = vunpack.c.1.s8 %v1208_v14 }
  0x11   :  { %vm465_vm14 = vmand %vm455_vm10, %vm461_vm12  ;;  %1275 = vmatprep.subr.bf16.mxu0 %v1343_v21  ;;  %1332 = vset.pattern.permute.xlu1 %v1413_v10  ;;  %v1214_v18 = vunpack.c.3.s8 %v1208_v14  ;;  %v1213_v19 = vunpack.c.2.s8 %v1208_v14  ;;  %vm651_vm4 = vcmask 15360  }
  0x12   :  { %vm1317_vm15 = vmpackc.low %vm465_vm14, %vm464_vm13  ;;  %v350_v28 = vunpack.c.0.s8 %v349_v27  ;;  %1331 = vset.pattern.permute.xlu0 %v1414_v11  ;;  %vm636_vm2 = vcmp.eq.s32.totalorder %v1210_v15, 2 }
  0x13   :  { %1270 = vmatmul.mubr.msk.bf16.gmra.mrb[4].mxu1 %vm59_vm1, %v1341_v16  ;;  %1318 = vmatprep.subr.msk.bf16.mxu1 %vm1317_vm15, %v1411_v17  ;;  %v1209_v16 = vunpack.c.0.s8 %v1208_v14  ;;  %vm1574_vm6 = vcmp.eq.s32.totalorder %v1214_v18, 1  ;;  %vm1578_vm7 = vcmp.eq.s32.totalorder %v1214_v18, 2  ;;  %vm1586_vm8 = vcmp.eq.s32.totalorder %v1213_v19, 1 }
  0x14   :  { %1320 = vmatpush3.bf16.msk.msra.mxu1 %vm1317_vm15, %v1411_v17  ;;  %1276 = vmatpush3.bf16.msra.mxu0 %v1343_v21  ;;  %v353_v29 = vsub.s32 %v350_v28, %v1497_v6  ;;  %v1322_v17 = vld [vmem:[%s1813_s3 + $0x8] sm:$0xff]   ;;  %vm1594_vm9 = vcmp.eq.s32.totalorder %v1213_v19, 2  ;;  %s1415_s3 = smov [#allocation2]  }
  0x15   :  { %1305 = vmatprep.subr.bf16.mxu0 %v1409_v1  ;;  %vm1570_vm3 = vcmp.eq.s32.totalorder %v1209_v16, 1  ;;  %v1218_v21 = vunpack.c.1.s8 %v1322_v17  ;;  %vm635_vm5 = vcmp.eq.s32.totalorder %v1209_v16, 2  ;;  %v1217_v27 = vunpack.c.0.s8 %v1322_v17  ;;  %s1134_s13 = sshll.u32 %s1415_s3, 4  ;;  %s1135_s13 = int_to_ptr.vmem [resolvable:$true] %s1134_s13 }
  0x16   :  { %s1385_s14 = scalar_lea.vmem %s1135_s13, 128  ;;  %p1390_p1 = scmp.lt.s32.totalorder %s1135_s13, %s1135_s13 }
  0x17   :  { %1278 = vmatmul.mubr.msk.bf16.vlgmr.msra.gmra.mrb[4].mxu0 %vm59_vm1, %v1345_v23  ;;  %vm1598_vm10 = vcmp.eq.s32.totalorder %v1218_v21, 1  ;;  %vm1604_vm11 = vcmp.eq.s32.totalorder %v1218_v21, 2  ;;  %vm1610_vm12 = vcmp.eq.s32.totalorder %v1217_v27, 1  ;;  %vm1614_vm13 = vcmp.eq.s32.totalorder %v1217_v27, 2  ;;  %p1386_p0 = scmp.ne.s32.totalorder %s1135_s13, %s1385_s14  ;;  %p1391_p2 = scmp.lt.s32.totalorder %s1385_s14, %s1385_s14 }
  0x18   :  { %1281 = vmatprep.mubr.msk.bf16.mxu0 %vm59_vm1, %v1346_v24 }
  0x19   :  { %p1392_p3 = por %p1391_p2, %p1390_p1 }
  0x1b   :  { %p1393_p4 = pnand %p1392_p3, %p1386_p0 }
  0x1f   :  { %1282 = vmatmul.mubr.msk.bf16.gmra.mrb[8].mxu0 %vm59_vm1, %v1347_v25 }
  0x20   :  { %1309 = vmatprep.mubr.msk.bf16.mxu0 %vm1410_vm0, %v1409_v1  ;;  %vm620_vm0 = vcmp.eq.s32.totalorder %v1210_v15, 1 }
  0xdc   :  { %v97_v30 = vpop.f32.mrb[0].mxu0 }
  0xdd   :  { %v345_v31 = vmul.f32 0.25, %v97_v30  ;;  %v1259_v32 = vpop.f32.mrb[1].mxu0 }
  0xde   :  { %v100_v33 = vpop.f32.mrb[2].mxu0  ;;  %v1267_v34 = vpop.f32.mrb[0].mxu1 }
  0xdf   :  { %v347_v35 = vcombine.high %v345_v31, %v345_v31  ;;  %v354_v36 = vrot.slane %v345_v31, %v353_v29  ;;  %v1260_v37 = vpop.f32.mrb[3].mxu0  ;;  %v193_v39 = vpop.f32.mrb[1].mxu1  ;;  %v1222_v31 = vunpack.c.3.s8 %v1322_v17 }
  0xe0   :  { %v1268_v40 = vpop.f32.mrb[2].mxu1 }
  0xe1   :  { %v361_v41 = vrot.slane %v347_v35, %v353_v29  ;;  %v362_v42 = vcombine.high %v354_v36, %v354_v36  ;;  %v370_v43 = vrot.slane %v354_v36, %v353_v29  ;;  %v196_v44 = vpop.f32.mrb[3].mxu1  ;;  %vm1624_vm14 = vcmp.eq.s32.totalorder %v1222_v31, 1 }
  0xe2   :  { %vm1634_vm15 = vcmp.eq.s32.totalorder %v1222_v31, 2 }
  0xe3   :  { %v363_v45 = vcombine.high %v361_v41, %v361_v41  ;;  %v392_v46 = vcombine.high %v370_v43, %v370_v43  ;;  %v399_v47 = vrot.slane %v370_v43, %v398_v38  ;;  %v384_v48 = vrot.slane %v362_v42, %v353_v29 }
  0xe4   :  { %v377_v49 = vrot.slane %v361_v41, %v353_v29 }
  0xe5   :  { %v407_v50 = vrot.slane %v392_v46, %v398_v38  ;;  %v436_v51 = vmul.f32 %v399_v47, %v193_v39  ;;  %v394_v52 = vcombine.high %v384_v48, %v384_v48  ;;  %v403_v53 = vrot.slane %v384_v48, %v398_v38 }
  0xe6   :  { %v1271_v54 = vpop.f32.mrb[4].mxu1  ;;  %v393_v55 = vcombine.high %v377_v49, %v377_v49  ;;  %v415_v56 = vrot.slane %v377_v49, %v398_v38  ;;  %v391_v57 = vrot.slane %v363_v45, %v353_v29 }
  0xe7   :  { %v438_v58 = vmul.f32 %v1267_v34, %v407_v50  ;;  %v411_v59 = vrot.slane %v394_v52, %v398_v38  ;;  %v437_v60 = vmul.f32 %v403_v53, %v196_v44  ;;  %v209_v61 = vpop.f32.mrb[5].mxu1  ;;  %1293 = vmatprep.mubr.msk.f32.mxu1 %vm59_vm1, %v436_v51 }
  0xe8   :  { %v423_v62 = vrot.slane %v393_v55, %v398_v38  ;;  %v440_v63 = vmul.f32 %v415_v56, %v209_v61  ;;  %v1272_v0 = vpop.f32.mrb[6].mxu1  ;;  %v395_v2 = vcombine.high %v391_v57, %v391_v57  ;;  %v419_v3 = vrot.slane %v391_v57, %v398_v38 }
  0xe9   :  { %v439_v4 = vmul.f32 %v1268_v40, %v411_v59  ;;  %v212_v5 = vpop.f32.mrb[7].mxu1  ;;  %1294 = vmatmul.mubr.msk.f32.vlgmr.msra.gmra.mrb[8].mxu1 %vm59_vm1, %v437_v60  ;;  %v1221_v40 = vunpack.c.2.s8 %v1322_v17 }
  0xea   :  { %v442_v6 = vmul.f32 %v1271_v54, %v423_v62  ;;  %v427_v7 = vrot.slane %v395_v2, %v398_v38  ;;  %v441_v8 = vmul.f32 %v419_v3, %v212_v5  ;;  %1296 = vmatprep.mubr.msk.f32.mxu1 %vm59_vm1, %v438_v58  ;;  %v1560_v12 = vpop.f32.mrb[4].mxu0 }
  0xeb   :  { %v1562_v13 = vpop.f32.mrb[5].mxu0 }
  0xec   :  { %v443_v9 = vmul.f32 %v1272_v0, %v427_v7 }
  0xed   :  { %1297 = vmatmul.mubr.msk.f32.gmra.mrb[10].mxu1 %vm59_vm1, %v439_v4 }
  0xee   :  { %1299 = vmatprep.mubr.msk.f32.mxu1 %vm59_vm1, %v440_v63 }
  0xf1   :  { %1300 = vmatmul.mubr.msk.f32.gmra.mrb[12].mxu1 %vm59_vm1, %v441_v8 }
  0xf2   :  { %1302 = vmatprep.mubr.msk.f32.mxu1 %vm59_vm1, %v442_v6 }
  0xf5   :  { %1303 = vmatmul.mubr.msk.f32.gmra.mrb[14].mxu1 %vm59_vm1, %v443_v9 }
 0x1bc   :  { %v1295_v22 = vpop.f32.mrb[8].mxu1 }
 0x1bd   :  { %v628_v23 = vsel %vm620_vm0, -1e+10, %v1295_v22  ;;  %v564_v24 = vpop.f32.mrb[9].mxu1  ;;  %vm1640_vm0 = vcmp.eq.s32.totalorder %v1221_v40, 1 }
 0x1be   :  { %v1582_v28 = vsel %vm636_vm2, -3.4028235e+38, %v628_v23  ;;  %v627_v29 = vsel %vm1570_vm3, -1e+10, %v564_v24  ;;  %vm1646_vm2 = vcmp.eq.s32.totalorder %v1221_v40, 2  ;;  %vm836_vm3 = vcmask 11264  }
 0x1bf   :  { %v659_v32 = vsel %vm651_vm4, %v1582_v28, -inf  ;;  %v1592_v33 = vsel %vm635_vm5, -3.4028235e+38, %v627_v29  ;;  %vm1025_vm5 = vcmask 1041409  }
 0x1c0   :  { %v660_v36 = vrot.slane %v659_v32, 4  ;;  %v652_v37 = vsel %vm651_vm4, %v1592_v33, -inf  ;;  %v1298_v38 = vpop.f32.mrb[10].mxu1 }
 0x1c1   :  { %v653_v41 = vrot.slane %v652_v37, 4  ;;  %v630_v42 = vsel %vm1574_vm6, -1e+10, %v1298_v38  ;;  %v574_v43 = vpop.f32.mrb[11].mxu1  ;;  %vm1027_vm6 = vcmask 1042434  }
 0x1c2   :  { %v661_v46 = vmax.f32 %v659_v32, %v660_v36  ;;  %v1620_v47 = vsel %vm1578_vm7, -3.4028235e+38, %v630_v42  ;;  %v629_v48 = vsel %vm1586_vm8, -1e+10, %v574_v43  ;;  %vm1029_vm7 = vcmask 1043459  }
 0x1c3   :  { %v654_v50 = vmax.f32 %v652_v37, %v653_v41  ;;  %v673_v51 = vsel %vm651_vm4, %v1620_v47, -inf  ;;  %v1632_v52 = vsel %vm1594_vm9, -3.4028235e+38, %v629_v48  ;;  %vm1031_vm8 = vcmask 1044484  }
 0x1c4   :  { %v662_v54 = vrot.slane %v661_v46, 2  ;;  %v674_v55 = vrot.slane %v673_v51, 4  ;;  %v666_v56 = vsel %vm651_vm4, %v1632_v52, -inf  ;;  %v1301_v57 = vpop.f32.mrb[12].mxu1  ;;  %vm1033_vm9 = vcmask 1045509  }
 0x1c5   :  { %v655_v59 = vrot.slane %v654_v50, 2  ;;  %v667_v60 = vrot.slane %v666_v56, 4  ;;  %v632_v61 = vsel %vm1598_vm10, -1e+10, %v1301_v57  ;;  %v584_v62 = vpop.f32.mrb[13].mxu1  ;;  %vm1035_vm10 = vcmask 1046534  }
 0x1c6   :  { %v663_v0 = vmax.f32 %v661_v46, %v662_v54  ;;  %v675_v2 = vmax.f32 %v673_v51, %v674_v55  ;;  %v648_v3 = vsel %vm1604_vm11, -3.4028235e+38, %v632_v61  ;;  %v631_v4 = vsel %vm1610_vm12, -1e+10, %v584_v62 }
 0x1c7   :  { %v656_v5 = vmax.f32 %v654_v50, %v655_v59  ;;  %v668_v6 = vmax.f32 %v666_v56, %v667_v60  ;;  %v687_v7 = vsel %vm651_vm4, %v648_v3, -inf  ;;  %v647_v8 = vsel %vm1614_vm13, -3.4028235e+38, %v631_v4 }
 0x1c8   :  { %v664_v9 = vrot.slane %v663_v0, 1  ;;  %v676_v11 = vrot.slane %v675_v2, 2  ;;  %v688_v14 = vrot.slane %v687_v7, 4  ;;  %v680_v15 = vsel %vm651_vm4, %v647_v8, -inf  ;;  %v1304_v16 = vpop.f32.mrb[14].mxu1 }
 0x1c9   :  { %v657_v17 = vrot.slane %v656_v5, 1  ;;  %v669_v18 = vrot.slane %v668_v6, 2  ;;  %v681_v19 = vrot.slane %v680_v15, 4  ;;  %v634_v20 = vsel %vm1624_vm14, -1e+10, %v1304_v16  ;;  %v594_v21 = vpop.f32.mrb[15].mxu1 }
 0x1ca   :  { %v665_v22 = vmax.f32 %v663_v0, %v664_v9  ;;  %v677_v23 = vmax.f32 %v675_v2, %v676_v11  ;;  %v689_v24 = vmax.f32 %v687_v7, %v688_v14  ;;  %v650_v25 = vsel %vm1634_vm15, -3.4028235e+38, %v634_v20 }
 0x1cb   :  { %v658_v26 = vmax.f32 %v656_v5, %v657_v17  ;;  %v670_v27 = vmax.f32 %v668_v6, %v669_v18  ;;  %v682_v29 = vmax.f32 %v680_v15, %v681_v19  ;;  %v701_v30 = vsel %vm651_vm4, %v650_v25, -inf }
 0x1cc   :  { %v709_v31 = vsub.f32 %v1582_v28, %v665_v22  ;;  %v678_v32 = vrot.slane %v677_v23, 1  ;;  %v690_v34 = vrot.slane %v689_v24, 2  ;;  %v702_v35 = vrot.slane %v701_v30, 4 }
 0x1cd   :  { %v708_v36 = vsub.f32 %v1592_v33, %v658_v26  ;;  %v671_v37 = vrot.slane %v670_v27, 1  ;;  %v683_v38 = vrot.slane %v682_v29, 2  ;;  %v633_v39 = vsel %vm1640_vm0, -1e+10, %v594_v21 }
 0x1ce   :  { %v718_v40 = vmul.f32 1.442695, %v709_v31  ;;  %v679_v41 = vmax.f32 %v677_v23, %v678_v32  ;;  %v691_v42 = vmax.f32 %v689_v24, %v690_v34  ;;  %v703_v43 = vmax.f32 %v701_v30, %v702_v35 }
 0x1cf   :  { %v716_v44 = vmul.f32 1.442695, %v708_v36  ;;  %v672_v45 = vmax.f32 %v670_v27, %v671_v37  ;;  %v684_v46 = vmax.f32 %v682_v29, %v683_v38  ;;  %v649_v28 = vsel %vm1646_vm2, -3.4028235e+38, %v633_v39 }
 0x1d0   :  { %1350 = vpow2.f32 %v718_v40  ;;  %v711_v48 = vsub.f32 %v1620_v47, %v679_v41  ;;  %v692_v49 = vrot.slane %v691_v42, 1  ;;  %v704_v33 = vrot.slane %v703_v43, 2 }
 0x1d1   :  { %1352 = vpow2.f32 %v716_v44  ;;  %v710_v50 = vsub.f32 %v1632_v52, %v672_v45  ;;  %v685_v51 = vrot.slane %v684_v46, 1  ;;  %v694_v53 = vsel %vm651_vm4, %v649_v28, -inf }
 0x1d2   :  { %v722_v54 = vmul.f32 1.442695, %v711_v48  ;;  %v693_v55 = vmax.f32 %v691_v42, %v692_v49  ;;  %v705_v56 = vmax.f32 %v703_v43, %v704_v33  ;;  %v695_v57 = vrot.slane %v694_v53, 4 }
 0x1d3   :  { %v720_v58 = vmul.f32 1.442695, %v710_v50  ;;  %v686_v59 = vmax.f32 %v684_v46, %v685_v51  ;;  %vm1037_vm11 = vcmask 1047559  }
 0x1d4   :  { %1354 = vpow2.f32 %v722_v54  ;;  %v713_v60 = vsub.f32 %v648_v3, %v693_v55  ;;  %v706_v61 = vrot.slane %v705_v56, 1  ;;  %v696_v62 = vmax.f32 %v694_v53, %v695_v57 }
 0x1d5   :  { %1356 = vpow2.f32 %v720_v58  ;;  %v712_v47 = vsub.f32 %v647_v8, %v686_v59 }
 0x1d6   :  { %v726_v63 = vmul.f32 1.442695, %v713_v60  ;;  %v707_v0 = vmax.f32 %v705_v56, %v706_v61  ;;  %v697_v2 = vrot.slane %v696_v62, 2 }
 0x1d7   :  { %v724_v4 = vmul.f32 1.442695, %v712_v47 }
 0x1d8   :  { %1358 = vpow2.f32 %v726_v63  ;;  %v715_v52 = vsub.f32 %v650_v25, %v707_v0  ;;  %v698_v5 = vmax.f32 %v696_v62, %v697_v2 }
 0x1d9   :  { %1360 = vpow2.f32 %v724_v4 }
 0x1da   :  { %v1672_v6 = vpop.eup %1350  ;;  %v730_v7 = vmul.f32 1.442695, %v715_v52  ;;  %v699_v9 = vrot.slane %v698_v5, 1 }
 0x1db   :  { %v1674_v11 = vpop.eup %1352  ;;  %v739_v3 = vsel %vm651_vm4, %v1672_v6, 0.0 }
 0x1dc   :  { %v740_v14 = vrot.slane %v739_v3, 4  ;;  %v732_v8 = vsel %vm651_vm4, %v1674_v11, 0.0  ;;  %1362 = vpow2.f32 %v730_v7  ;;  %v700_v15 = vmax.f32 %v698_v5, %v699_v9 }
 0x1dd   :  { %v733_v16 = vrot.slane %v732_v8, 4 }
 0x1de   :  { %v1680_v17 = vpop.eup %1354  ;;  %v741_v18 = vadd.f32 %v740_v14, %v739_v3  ;;  %v714_v19 = vsub.f32 %v649_v28, %v700_v15 }
 0x1df   :  { %v1682_v20 = vpop.eup %1356  ;;  %v734_v21 = vadd.f32 %v733_v16, %v732_v8  ;;  %v753_v22 = vsel %vm651_vm4, %v1680_v17, 0.0 }
 0x1e0   :  { %v742_v23 = vrot.slane %v741_v18, 2  ;;  %v754_v24 = vrot.slane %v753_v22, 4  ;;  %v746_v25 = vsel %vm651_vm4, %v1682_v20, 0.0  ;;  %v728_v26 = vmul.f32 1.442695, %v714_v19 }
 0x1e1   :  { %v735_v27 = vrot.slane %v734_v21, 2  ;;  %v747_v29 = vrot.slane %v746_v25, 4 }
 0x1e2   :  { %v1688_v30 = vpop.eup %1358  ;;  %v755_v31 = vadd.f32 %v754_v24, %v753_v22  ;;  %1364 = vpow2.f32 %v728_v26  ;;  %v743_v32 = vadd.f32 %v742_v23, %v741_v18  ;;  %v1706_v23 = vpop.f32.mrb[6].mxu0 }
 0x1e3   :  { %v1690_v34 = vpop.eup %1360  ;;  %v748_v35 = vadd.f32 %v747_v29, %v746_v25  ;;  %v767_v36 = vsel %vm651_vm4, %v1688_v30, 0.0  ;;  %v736_v37 = vadd.f32 %v735_v27, %v734_v21  ;;  %v317_v25 = vpop.f32.mrb[7].mxu0 }
 0x1e4   :  { %v756_v38 = vrot.slane %v755_v31, 2  ;;  %v768_v39 = vrot.slane %v767_v36, 4  ;;  %v760_v40 = vsel %vm651_vm4, %v1690_v34, 0.0  ;;  %v744_v41 = vrot.slane %v743_v32, 1 }
 0x1e5   :  { %v749_v42 = vrot.slane %v748_v35, 2  ;;  %v761_v43 = vrot.slane %v760_v40, 4  ;;  %v737_v44 = vrot.slane %v736_v37, 1 }
 0x1e6   :  { %v1696_v45 = vpop.eup %1362  ;;  %v769_v46 = vadd.f32 %v768_v39, %v767_v36  ;;  %v745_v28 = vadd.f32 %v744_v41, %v743_v32  ;;  %v757_v48 = vadd.f32 %v756_v38, %v755_v31 }
 0x1e7   :  { %v762_v49 = vadd.f32 %v761_v43, %v760_v40  ;;  %v781_v33 = vsel %vm651_vm4, %v1696_v45, 0.0  ;;  %v738_v50 = vadd.f32 %v737_v44, %v736_v37  ;;  %v750_v51 = vadd.f32 %v749_v42, %v748_v35 }
 0x1e8   :  { %v770_v53 = vrot.slane %v769_v46, 2  ;;  %v782_v54 = vrot.slane %v781_v33, 4  ;;  %1366 = vrcp.f32 %v745_v28  ;;  %v758_v55 = vrot.slane %v757_v48, 1 }
 0x1e9   :  { %v763_v56 = vrot.slane %v762_v49, 2  ;;  %1368 = vrcp.f32 %v738_v50  ;;  %v751_v57 = vrot.slane %v750_v51, 1 }
 0x1ea   :  { %v783_v58 = vadd.f32 %v782_v54, %v781_v33  ;;  %v759_v59 = vadd.f32 %v758_v55, %v757_v48  ;;  %v771_v60 = vadd.f32 %v770_v53, %v769_v46  ;;  %v1349_v33 = vld [vmem:[%s1817_s7 + $0x8] sm:$0xff]  }
 0x1eb   :  { %v752_v61 = vadd.f32 %v751_v57, %v750_v51  ;;  %v764_v62 = vadd.f32 %v763_v56, %v762_v49  ;;  %v1348_v49 = vld [vmem:[%s1817_s7] sm:$0xff]  }
 0x1ec   :  { %v1700_v47 = vpop.eup %1364  ;;  %v784_v63 = vrot.slane %v783_v58, 2  ;;  %1370 = vrcp.f32 %v759_v59  ;;  %v772_v0 = vrot.slane %v771_v60, 1  ;;  %1306 = vmatpush3.bf16.msra.mxu0 %v1348_v49 }
 0x1ed   :  { %v774_v2 = vsel %vm651_vm4, %v1700_v47, 0.0  ;;  %1372 = vrcp.f32 %v752_v61  ;;  %v765_v4 = vrot.slane %v764_v62, 1  ;;  %1307 = vmatprep.subr.bf16.mxu0 %v1409_v1  ;;  %vm917_vm4 = vcmask 130048  }
 0x1ee   :  { %v775_v52 = vrot.slane %v774_v2, 4  ;;  %v773_v5 = vadd.f32 %v772_v0, %v771_v60  ;;  %v785_v7 = vadd.f32 %v784_v63, %v783_v58 }
 0x1ef   :  { %v766_v9 = vadd.f32 %v765_v4, %v764_v62 }
 0x1f0   :  { %v776_v3 = vadd.f32 %v775_v52, %v774_v2  ;;  %1374 = vrcp.f32 %v773_v5  ;;  %v786_v14 = vrot.slane %v785_v7, 1  ;;  %1308 = vmatpush3.bf16.msra.mxu0 %v1349_v33 }
 0x1f1   :  { %1376 = vrcp.f32 %v766_v9 }
 0x1f2   :  { %v1367_v8 = vpop.eup %1366  ;;  %v777_v15 = vrot.slane %v776_v3, 2  ;;  %v787_v16 = vadd.f32 %v786_v14, %v785_v7 }
 0x1f3   :  { %v1369_v18 = vpop.eup %1368  ;;  %v791_v19 = vmul.f32 %v1367_v8, %v1672_v6 }
 0x1f4   :  { %v789_v21 = vmul.f32 %v1369_v18, %v1674_v11  ;;  %v778_v22 = vadd.f32 %v777_v15, %v776_v3  ;;  %1378 = vrcp.f32 %v787_v16 }
 0x1f5   :  { %890 = vperm.xlu1 %1332, %v791_v19   ;;  %v1200_v24 = vpack.c.bf16 %v791_v19, %v791_v19  ;;  %852 = vperm.xlu0 %1331, %v791_v19  }
 0x1f6   :  { %v1371_v26 = vpop.eup %1370  ;;  %v1199_v27 = vpack.c.bf16 %v789_v21, %v789_v21  ;;  %v779_v29 = vrot.slane %v778_v22, 1 }
 0x1f7   :  { %v1373_v31 = vpop.eup %1372  ;;  %838 = vst.msk [vmem:[%s1822_s12 + $0x4] sm:$0xf] %vm836_vm3, %v1200_v24  ;;  %v795_v6 = vmul.f32 %v1371_v26, %v1680_v17 }
 0x1f8   :  { %837 = vst.msk [vmem:[%s1822_s12] sm:$0xf] %vm836_vm3, %v1199_v27  ;;  %v793_v11 = vmul.f32 %v1373_v31, %v1682_v20  ;;  %v780_v32 = vadd.f32 %v779_v29, %v778_v22 }
 0x1f9   :  { %886 = vperm.xlu1 %1332, %v789_v21   ;;  %847 = vperm.xlu0 %1331, %v789_v21   ;;  %v1202_v35 = vpack.c.bf16 %v795_v6, %v795_v6 }
 0x1fa   :  { %v1375_v36 = vpop.eup %1374  ;;  %v1201_v37 = vpack.c.bf16 %v793_v11, %v793_v11  ;;  %1380 = vrcp.f32 %v780_v32 }
 0x1fb   :  { %v1377_v38 = vpop.eup %1376  ;;  %840 = vst.msk [vmem:[%s1822_s12 + $0xc] sm:$0xf] %vm836_vm3, %v1202_v35  ;;  %v799_v17 = vmul.f32 %v1375_v36, %v1688_v30 }
 0x1fc   :  { %839 = vst.msk [vmem:[%s1822_s12 + $0x8] sm:$0xf] %vm836_vm3, %v1201_v37  ;;  %v797_v20 = vmul.f32 %v1377_v38, %v1690_v34 }
 0x1fd   :  { %898 = vperm.xlu1 %1332, %v795_v6   ;;  %862 = vperm.xlu0 %1331, %v795_v6   ;;  %v1204_v39 = vpack.c.bf16 %v799_v17, %v799_v17 }
 0x1fe   :  { %v1379_v40 = vpop.eup %1378  ;;  %v1203_v41 = vpack.c.bf16 %v797_v20, %v797_v20 }
 0x1ff   :  { %842 = vst.msk [vmem:[%s1822_s12 + $0x14] sm:$0xf] %vm836_vm3, %v1204_v39  ;;  %v803_v42 = vmul.f32 %v1379_v40, %v1696_v45  ;;  %v1742_v45 = vpop.f32.mrb[8].mxu0 }
 0x200   :  { %841 = vst.msk [vmem:[%s1822_s12 + $0x10] sm:$0xf] %vm836_vm3, %v1203_v41  ;;  %v1744_v46 = vpop.f32.mrb[9].mxu0 }
 0x201   :  { %894 = vperm.xlu1 %1332, %v793_v11   ;;  %857 = vperm.xlu0 %1331, %v793_v11   ;;  %v1206_v30 = vpack.c.bf16 %v803_v42, %v803_v42  ;;  %v1750_v28 = vpop.f32.mrb[10].mxu0 }
 0x202   :  { %v333_v48 = vpop.f32.mrb[11].mxu0 }
 0x203   :  { %844 = vst.msk [vmem:[%s1822_s12 + $0x1c] sm:$0xf] %vm836_vm3, %v1206_v30 }
 0x204   :  { %v1381_v34 = vpop.eup %1380 }
 0x205   :  { %906 = vperm.xlu1 %1332, %v799_v17   ;;  %872 = vperm.xlu0 %1331, %v799_v17   ;;  %v801_v43 = vmul.f32 %v1381_v34, %v1700_v47 }
 0x207   :  { %v1205_v44 = vpack.c.bf16 %v801_v43, %v801_v43 }
 0x209   :  { %902 = vperm.xlu1 %1332, %v797_v20   ;;  %867 = vperm.xlu0 %1331, %v797_v20   ;;  %843 = vst.msk [vmem:[%s1822_s12 + $0x18] sm:$0xf] %vm836_vm3, %v1205_v44 }
 0x20d   :  { %910 = vperm.xlu1 %1332, %v801_v43   ;;  %877 = vperm.xlu0 %1331, %v801_v43  }
 0x211   :  { %914 = vperm.xlu1 %1332, %v803_v42   ;;  %882 = vperm.xlu0 %1331, %v803_v42  }
 0x215   :  { %1333 = vset.pattern.permute.xlu0 %v1413_v10 }
 0x274   :  { %v891_v50 = vpop.permute.xlu1 %890  ;;  %v853_v51 = vpop.permute.xlu0 %852 }
 0x275   :  { %v919_v53 = vsel %vm917_vm4, %v853_v51, %v891_v50 }
 0x276   :  { %v927_v54 = vmul.f32 %v919_v53, %v317_v25 }
 0x278   :  { %v941_v10 = vsel %vm59_vm1, %v927_v54, 0.0  ;;  %v887_v55 = vpop.permute.xlu1 %886  ;;  %v848_v56 = vpop.permute.xlu0 %847 }
 0x279   :  { %v942_v57 = vrot.slane %v941_v10, 4  ;;  %v918_v58 = vsel %vm917_vm4, %v848_v56, %v887_v55 }
 0x27a   :  { %v926_v59 = vmul.f32 %v918_v58, %v1562_v13 }
 0x27b   :  { %v943_v60 = vadd.f32 %v942_v57, %v941_v10 }
 0x27c   :  { %v934_v61 = vsel %vm59_vm1, %v926_v59, 0.0  ;;  %v899_v1 = vpop.permute.xlu1 %898  ;;  %v863_v62 = vpop.permute.xlu0 %862 }
 0x27d   :  { %v944_v47 = vrot.slane %v943_v60, 2  ;;  %v935_v63 = vrot.slane %v934_v61, 4  ;;  %v921_v0 = vsel %vm917_vm4, %v863_v62, %v899_v1 }
 0x27e   :  { %v929_v2 = vmul.f32 %v1706_v23, %v921_v0 }
 0x27f   :  { %v945_v4 = vadd.f32 %v944_v47, %v943_v60  ;;  %v936_v52 = vadd.f32 %v935_v63, %v934_v61 }
 0x280   :  { %v955_v5 = vsel %vm59_vm1, %v929_v2, 0.0  ;;  %v895_v7 = vpop.permute.xlu1 %894  ;;  %v858_v9 = vpop.permute.xlu0 %857 }
 0x281   :  { %v946_v3 = vrot.slane %v945_v4, 1  ;;  %v937_v14 = vrot.slane %v936_v52, 2  ;;  %v956_v13 = vrot.slane %v955_v5, 4  ;;  %v920_v8 = vsel %vm917_vm4, %v858_v9, %v895_v7 }
 0x282   :  { %v928_v15 = vmul.f32 %v1560_v12, %v920_v8 }
 0x283   :  { %v947_v16 = vadd.f32 %v946_v3, %v945_v4  ;;  %v938_v18 = vadd.f32 %v937_v14, %v936_v52  ;;  %v957_v19 = vadd.f32 %v956_v13, %v955_v5 }
 0x284   :  { %v948_v21 = vsel %vm59_vm1, %v928_v15, 0.0  ;;  %v907_v22 = vpop.permute.xlu1 %906  ;;  %v873_v23 = vpop.permute.xlu0 %872 }
 0x285   :  { %v939_v24 = vrot.slane %v938_v18, 1  ;;  %v958_v25 = vrot.slane %v957_v19, 2  ;;  %v949_v26 = vrot.slane %v948_v21, 4  ;;  %v923_v27 = vsel %vm917_vm4, %v873_v23, %v907_v22 }
 0x286   :  { %v991_v29 = vpack.c.bf16 %v947_v16, %v947_v16  ;;  %v931_v32 = vmul.f32 %v923_v27, %v333_v48 }
 0x287   :  { %v940_v31 = vadd.f32 %v939_v24, %v938_v18  ;;  %v959_v6 = vadd.f32 %v958_v25, %v957_v19  ;;  %v950_v11 = vadd.f32 %v949_v26, %v948_v21 }
 0x288   :  { %v903_v35 = vpop.permute.xlu1 %902  ;;  %v868_v36 = vpop.permute.xlu0 %867  ;;  %v969_v20 = vsel %vm59_vm1, %v931_v32, 0.0  ;;  %v1018_v40 = vunpack.c.l.b16 %v991_v29 }
 0x289   :  { %v990_v12 = vpack.c.bf16 %v940_v31, %v940_v31  ;;  %v960_v37 = vrot.slane %v959_v6, 1  ;;  %v951_v38 = vrot.slane %v950_v11, 2  ;;  %v922_v17 = vsel %vm917_vm4, %v868_v36, %v903_v35 }
 0x28a   :  { %v930_v39 = vmul.f32 %v922_v17, %v1744_v46  ;;  %v970_v30 = vrot.slane %v969_v20, 4  ;;  %v1193_v17 = vld [vmem:[%s1818_s8] ss:$0 sm:$0xff] }
 0x28b   :  { %v1017_v41 = vunpack.c.l.b16 %v990_v12  ;;  %v952_v42 = vadd.f32 %v951_v38, %v950_v11  ;;  %v961_v34 = vadd.f32 %v960_v37, %v959_v6 }
 0x28c   :  { %v962_v43 = vsel %vm59_vm1, %v930_v39, 0.0  ;;  %v911_v44 = vpop.permute.xlu1 %910  ;;  %v878_v48 = vpop.permute.xlu0 %877  ;;  %v971_v50 = vadd.f32 %v970_v30, %v969_v20  ;;  %v1384_v20 = vld [vmem:[%s1810_s0] sm:$0xf] }
 0x28d   :  { %v1026_v49 = vsel %vm1025_vm5, %v1018_v40, %v1017_v41  ;;  %v953_v33 = vrot.slane %v952_v42, 1  ;;  %v963_v51 = vrot.slane %v962_v43, 4  ;;  %v924_v53 = vsel %vm917_vm4, %v878_v48, %v911_v44 }
 0x28e   :  { %v972_v10 = vrot.slane %v971_v50, 2  ;;  %v932_v55 = vmul.f32 %v1742_v45, %v924_v53  ;;  %v993_v46 = vpack.c.bf16 %v961_v34, %v961_v34  ;;  %v1095_v39 = vunpack.c.l.bf16 %v1384_v20 }
 0x28f   :  { %v954_v54 = vadd.f32 %v953_v33, %v952_v42  ;;  %v964_v56 = vadd.f32 %v963_v51, %v962_v43 }
 0x290   :  { %v915_v57 = vpop.permute.xlu1 %914  ;;  %v883_v58 = vpop.permute.xlu0 %882  ;;  %v973_v60 = vadd.f32 %v972_v10, %v971_v50  ;;  %v976_v61 = vsel %vm59_vm1, %v932_v55, 0.0  ;;  %v1020_v4 = vunpack.c.l.b16 %v993_v46  ;;  %v1197_v46 = vld [vmem:[%s1819_s9] ss:$0 sm:$0xff] }
 0x291   :  { %v992_v59 = vpack.c.bf16 %v954_v54, %v954_v54  ;;  %v925_v1 = vsel %vm917_vm4, %v883_v58, %v915_v57  ;;  %v965_v62 = vrot.slane %v964_v56, 2  ;;  %v977_v47 = vrot.slane %v976_v61, 4  ;;  %v1198_v57 = vld [vmem:[%s1820_s10] ss:$0 sm:$0xff] }
 0x292   :  { %v933_v63 = vmul.f32 %v1750_v28, %v925_v1  ;;  %v974_v2 = vrot.slane %v973_v60, 1 }
 0x293   :  { %v1019_v0 = vunpack.c.l.b16 %v992_v59  ;;  %v966_v45 = vadd.f32 %v965_v62, %v964_v56  ;;  %v978_v52 = vadd.f32 %v977_v47, %v976_v61 }
 0x294   :  { %v983_v5 = vsel %vm59_vm1, %v933_v63, 0.0  ;;  %v975_v9 = vadd.f32 %v974_v2, %v973_v60 }
 0x295   :  { %v1028_v7 = vsel %vm1027_vm6, %v1019_v0, %v1026_v49  ;;  %v984_v3 = vrot.slane %v983_v5, 4  ;;  %v967_v14 = vrot.slane %v966_v45, 1  ;;  %v979_v8 = vrot.slane %v978_v52, 2 }
 0x296   :  { %v1030_v13 = vsel %vm1029_vm7, %v1020_v4, %v1028_v7  ;;  %v995_v19 = vpack.c.bf16 %v975_v9, %v975_v9 }
 0x297   :  { %v985_v15 = vadd.f32 %v984_v3, %v983_v5  ;;  %v968_v16 = vadd.f32 %v967_v14, %v966_v45  ;;  %v980_v18 = vadd.f32 %v979_v8, %v978_v52 }
 0x298   :  { %v1022_v26 = vunpack.c.l.b16 %v995_v19 }
 0x299   :  { %v986_v21 = vrot.slane %v985_v15, 2  ;;  %v994_v28 = vpack.c.bf16 %v968_v16, %v968_v16  ;;  %v981_v22 = vrot.slane %v980_v18, 1 }
 0x29b   :  { %v987_v23 = vadd.f32 %v986_v21, %v985_v15  ;;  %v1021_v24 = vunpack.c.l.b16 %v994_v28  ;;  %v982_v25 = vadd.f32 %v981_v22, %v980_v18 }
 0x29d   :  { %v988_v27 = vrot.slane %v987_v23, 1  ;;  %v1032_v29 = vsel %vm1031_vm8, %v1021_v24, %v1030_v13  ;;  %v996_v31 = vpack.c.bf16 %v982_v25, %v982_v25 }
 0x29e   :  { %v1034_v6 = vsel %vm1033_vm9, %v1022_v26, %v1032_v29 }
 0x29f   :  { %v989_v11 = vadd.f32 %v988_v27, %v987_v23  ;;  %v1023_v32 = vunpack.c.l.b16 %v996_v31 }
 0x2a1   :  { %v997_v35 = vpack.c.bf16 %v989_v11, %v989_v11  ;;  %v1036_v36 = vsel %vm1035_vm10, %v1023_v32, %v1034_v6 }
 0x2a3   :  { %v1024_v12 = vunpack.c.l.b16 %v997_v35 }
 0x2a5   :  { %v1038_v37 = vsel %vm1037_vm11, %v1024_v12, %v1036_v36 }
 0x2a6   :  { %v1039_v38 = vpack.c.b16 %v1038_v37, %v1038_v37 }
 0x2a8   :  { %1310 = vmatmul.mubr.msk.bf16.vlgmr.msra.gmra.mrb[12].mxu0 %vm59_vm1, %v1039_v38 }
 0x37b   :  { %v1089_v40 = vpop.f32.mrb[12].mxu0 }
 0x37c   :  { %v1090_v41 = vadd.f32 %v1193_v17, %v1089_v40  ;;  %v1311_v42 = vpop.f32.mrb[13].mxu0 }
 0x37d   :  { %v1092_v30 = vpop.f32.mrb[14].mxu0 }
 0x37e   :  { %v1312_v34 = vpop.f32.mrb[15].mxu0  ;;  %v1096_v43 = vadd.f32 %v1095_v39, %v1090_v41 }
 0x380   :  { %v1097_v44 = vsel %vm59_vm1, %v1096_v43, 0.0 }
 0x381   :  { %1098 = vadd.xlane.f32.xlu0 %v1097_v44 }
 0x40e   :  { %v1099_v48 = vpop.xlane.xlu0 %1098 }
 0x40f   :  { %v1101_v49 = vmul.f32 0.03125, %v1099_v48 }
 0x411   :  { %v1102_v33 = vsub.f32 %v1096_v43, %v1101_v49 }
 0x413   :  { %v1103_v50 = vmul.f32 %v1102_v33, %v1102_v33 }
 0x415   :  { %v1104_v51 = vsel %vm59_vm1, %v1103_v50, 0.0 }
 0x416   :  { %1105 = vadd.xlane.f32.xlu1 %v1104_v51 }
 0x4a3   :  { %v1106_v53 = vpop.xlane.xlu1 %1105 }
 0x4a4   :  { %v1107_v54 = vmul.f32 0.03125, %v1106_v53 }
 0x4a6   :  { %v1108_v10 = vadd.f32 1e-05, %v1107_v54 }
 0x4a8   :  { %1382 = vrsqrt.f32 %v1108_v10 }
 0x4b2   :  { %v1383_v55 = vpop.eup %1382 }
 0x4b3   :  { %v1110_v56 = vmul.f32 %v1383_v55, %v1102_v33 }
 0x4b5   :  { %v1118_v58 = vmul.f32 %v1197_v46, %v1110_v56 }
 0x4b7   :  { %v1126_v59 = vadd.f32 %v1198_v57, %v1118_v58 }
 0x4b9   :  { %1127 = vst.msk [vmem:[#allocation2] sm:$0xff] %vm59_vm1, %v1126_v59 }
 0x4ba   :  { %1396 = shalt.err (!%p1393_p4)
}
 0x4bb   :  { %s1397_s5 = scalar_lea.hbm %s1821_s11, 128 }
 0x4bc   :  { %p1398_p5 = scmp.ne.s32.totalorder %s1821_s11, %s1397_s5  ;;  %p1401_p6 = scmp.lt.u32.totalorder %s1397_s5, %s1821_s11 }
 0x4be   :  { %p1403_p7 = pnand %p1401_p6, %p1398_p5 }
 0x4c0   :  { %1406 = shalt.err (!%p1403_p7)
}
 0x4c1   :  { %1137 = dma.vmem_to_hbm [thread:$0]  %s1135_s13, 128, %s1821_s11, [#allocation3]  }
 0x4c2   :  { %1407 = dma.done.wait [#allocation3], 128  }
 0x4c3   :  { %1408 = vsyncadd [#allocation3], 4294967168 }
 0x4c4   :  { %1145 = vsyncpa [#allocation3], 1 }

</bundles_post_ra>
